<compile_context>
chip_gen: v6e
topology: v6e:2x2x1
jax: 0.10.0
libtpu: 0.0.40
codegen_flags: <defaults>
</compile_context>

<pallas_src>
import functools

import jax
import jax.numpy as jnp
from jax.experimental import pallas as pl
from jax.experimental.pallas import tpu as pltpu

_EPS = 1e-5


def _samplenet_kernel(x_ref, w_ref, gb_ref, out_ref, act_ref):
    """Grid axis = layer index (3 steps, "arbitrary").

    x_ref:   (n, d)    f32   small input batch (fetched once, resident)
    w_ref:   (1, d, d) bf16  this layer's pre-transposed weight (double-buffered)
    gb_ref:  (1, 2, d) f32   this layer's [gamma; beta]
    out_ref: (n, d)    f32   written only at the last layer
    act_ref: (n, d)    f32   activation carried across layers (VMEM scratch)
    """
    i = pl.program_id(0)
    last = pl.num_programs(0) - 1

    @pl.when(i == 0)
    def _():
        act_ref[...] = x_ref[...].astype(jnp.float32)

    # Linear (bias omitted: exactly cancelled by training-mode BatchNorm).
    # bf16 operands, f32 accumulation on the MXU.
    h = jnp.dot(act_ref[...].astype(jnp.bfloat16), w_ref[0],
                preferred_element_type=jnp.float32)

    # BatchNorm1d, training mode, single pass: var = E[h^2] - E[h]^2,
    # folded with the affine params into one fused scale/shift.
    nrows = jnp.float32(h.shape[0])
    mean = jnp.sum(h, axis=0, keepdims=True) / nrows
    ex2 = jnp.sum(h * h, axis=0, keepdims=True) / nrows
    var = ex2 - mean * mean
    gb = gb_ref[0]                                   # (2, d)
    gamma = gb[0:1, :]
    beta = gb[1:2, :]
    scale = gamma * jax.lax.rsqrt(var + _EPS)        # EUP rsqrt
    shift = beta - mean * scale
    hn = h * scale + shift

    @pl.when(i < last)
    def _():
        act_ref[...] = jnp.where(hn > 0, hn, 0.2 * hn)   # LeakyReLU(0.2)

    @pl.when(i == last)
    def _():
        out_ref[...] = jnp.tanh(hn).astype(out_ref.dtype)  # Tanh


def pack_params(params):
    """One-time parameter packing (keep OUTSIDE the per-call hot path).

    params: list of 3 tuples (W, b, gamma, beta). b is intentionally unused
    (exactly cancelled by training-mode BN)."""
    w_stack = jnp.stack([w.T for (w, _, _, _) in params], axis=0).astype(jnp.bfloat16)
    gb_stack = jnp.stack(
        [jnp.stack([g, be], axis=0) for (_, _, g, be) in params], axis=0
    ).astype(jnp.float32)                                       # (3, 2, d)
    return w_stack, gb_stack


@functools.partial(jax.jit, static_argnames=("t_batchsize",))
def samplenet_forward(x, w_stack, gb_stack, *, t_batchsize):
    """x: (t_sigma_num, d) f32. w_stack: (3, d, d) bf16 (pre-transposed).
    gb_stack: (3, 2, d) f32. Returns (t_batchsize, d) f32."""
    n, d = x.shape
    assert t_batchsize % n == 0
    repeat = t_batchsize // n
    n_layers = w_stack.shape[0]

    # VMEM budget: double-buffered bf16 weight + gb blocks, resident x/out/act.
    need = 2 * (d * d * 2) + 2 * (2 * d * 4) + 3 * (n * d * 4)
    vmem_limit = int(min(max(4 * need, 32 << 20), 64 << 20))

    out_small = pl.pallas_call(
        _samplenet_kernel,
        out_shape=jax.ShapeDtypeStruct((n, d), jnp.float32),
        grid_spec=pltpu.PrefetchScalarGridSpec(
            num_scalar_prefetch=0,
            grid=(n_layers,),
            in_specs=[
                pl.BlockSpec((n, d), lambda i: (0, 0)),          # x (resident)
                pl.BlockSpec((1, d, d), lambda i: (i, 0, 0)),    # per-layer W.T
                pl.BlockSpec((1, 2, d), lambda i: (i, 0, 0)),    # per-layer gamma/beta
            ],
            out_specs=pl.BlockSpec((n, d), lambda i: (0, 0)),
            scratch_shapes=[pltpu.VMEM((n, d), jnp.float32)],    # activation carry
        ),
        compiler_params=pltpu.CompilerParams(
            dimension_semantics=("arbitrary",),
            vmem_limit_bytes=vmem_limit,
        ),
    )(x.astype(jnp.float32), w_stack, gb_stack)

    # Replicate outside the kernel: repeat x fewer output HBM bytes, fuses into
    # downstream consumers.
    return jnp.tile(out_small, (repeat, 1))


def _reference_forward(x, params, t_batchsize, *, emulate_bf16=True):
    """Pure-JAX reference mirroring the PyTorch module (bias included,
    small-batch compute, two-pass variance, repeat at the end).

    emulate_bf16=True applies the same bf16 weight/LHS quantization the kernel
    uses, so the comparison isolates kernel bugs from deliberate precision
    choices."""
    a = x
    acts = [lambda v: jnp.where(v > 0, v, 0.2 * v)] * 2 + [jnp.tanh]
    for (w, b, g, be), act in zip(params, acts):
        if emulate_bf16:
            aq = a.astype(jnp.bfloat16).astype(jnp.float32)
            wq = w.astype(jnp.bfloat16).astype(jnp.float32)
        else:
            aq, wq = a, w
        h = aq @ wq.T + b
        mean = jnp.mean(h, axis=0, keepdims=True)
        var = jnp.mean((h - mean) ** 2, axis=0, keepdims=True)
        h = (h - mean) / jnp.sqrt(var + _EPS) * g + be
        a = act(h)
    return jnp.tile(a, (t_batchsize // x.shape[0], 1))


def make_params(key, feature_dim):
    """Deterministic init mirroring fresh nn.Linear / nn.BatchNorm1d shapes."""
    params = []
    bound = 1.0 / jnp.sqrt(feature_dim)
    for _ in range(3):
        kw, kb, key = jax.random.split(key, 3)
        w = jax.random.uniform(kw, (feature_dim, feature_dim), jnp.float32,
                               minval=-bound, maxval=bound)
        b = jax.random.uniform(kb, (feature_dim,), jnp.float32,
                               minval=-bound, maxval=bound)
        gamma = jnp.ones((feature_dim,), jnp.float32)
        beta = jnp.zeros((feature_dim,), jnp.float32)
        params.append((w, b, gamma, beta))
    return params


if __name__ == "__main__":
    feature_dim = 32
    t_batchsize = 32
    t_var = 1.0
    t_sigma_num = t_batchsize // 16  # = 2

    key = jax.random.PRNGKey(0)
    k_in, k_params = jax.random.split(key)

    # self._t_net_input = randn(t_sigma_num, feature_dim) * t_var ** 0.5
    # (the module samples its own input; we sample it with jax.random here)
    x = jax.random.normal(k_in, (t_sigma_num, feature_dim), jnp.float32) * (t_var ** 0.5)
    params = make_params(k_params, feature_dim)
    w_stack, gb_stack = pack_params(params)          # hoisted out of the hot path

    out = samplenet_forward(x, w_stack, gb_stack, t_batchsize=t_batchsize)
    out = jax.block_until_ready(out)

    ref = _reference_forward(x, params, t_batchsize)
    assert out.shape == (t_batchsize, feature_dim)
    # Tolerance covers summation-order + one-pass-vs-two-pass BN variance
    # differences (values are tanh-bounded, so 1e-2 abs is still a tight check).
    assert jnp.allclose(out, ref, atol=1e-2, rtol=1e-2), \
        float(jnp.max(jnp.abs(out - ref)))

    print("KERNEL_OK")
</pallas_src>

<mosaic_0001>
module attributes {stable_mosaic.version = 11 : i64} {
  func.func @_samplenet_kernel(%arg0: i32, %arg1: memref<2x32xf32, #tpu.memory_space<vmem>>, %arg2: memref<1x32x32xbf16, #tpu.memory_space<vmem>>, %arg3: memref<1x2x32xf32, #tpu.memory_space<vmem>>, %arg4: memref<2x32xf32, #tpu.memory_space<vmem>>, %arg5: memref<2x32xf32, #tpu.memory_space<vmem>>) attributes {dimension_semantics = [#tpu.dimension_semantics<arbitrary>], iteration_bounds = array<i64: 3>, scalar_prefetch = 0 : i64, scratch_operands = 1 : i64, tpu.core_type = #tpu.core_type<tc>, window_params = [{pipeline_mode = #tpu.pipeline_mode<synchronous>, transform_indices = @transform_0, window_bounds = array<i64: 2, 32>}, {transform_indices = @transform_1, window_bounds = array<i64: 1, 32, 32>}, {transform_indices = @transform_2, window_bounds = array<i64: 1, 2, 32>}, {pipeline_mode = #tpu.pipeline_mode<synchronous>, transform_indices = @transform_3, window_bounds = array<i64: 2, 32>}]} {
    %c0_i32 = arith.constant 0 : i32
    %0 = arith.cmpi eq, %arg0, %c0_i32 : i32
    %1 = arith.extui %0 : i1 to i32
    %c0_i32_0 = arith.constant 0 : i32
    %2 = arith.cmpi ne, %1, %c0_i32_0 : i32
    scf.if %2 {
      %c0_16 = arith.constant 0 : index
      %c0_17 = arith.constant 0 : index
      %39 = vector.load %arg1[%c0_16, %c0_17] : memref<2x32xf32, #tpu.memory_space<vmem>>, vector<2x32xf32>
      %c0_18 = arith.constant 0 : index
      %c0_19 = arith.constant 0 : index
      %40 = vector.load %arg5[%c0_18, %c0_19] : memref<2x32xf32, #tpu.memory_space<vmem>>, vector<2x32xf32>
      tpu.vector_store %arg5[%c0_18, %c0_19], %39 {strides = array<i32>} : memref<2x32xf32, #tpu.memory_space<vmem>>, vector<2x32xf32>,
    } else {
    }
    %c0 = arith.constant 0 : index
    %c0_1 = arith.constant 0 : index
    %3 = vector.load %arg5[%c0, %c0_1] : memref<2x32xf32, #tpu.memory_space<vmem>>, vector<2x32xf32>
    %4 = arith.truncf %3 : vector<2x32xf32> to vector<2x32xbf16>
    %c0_2 = arith.constant 0 : index
    %c0_3 = arith.constant 0 : index
    %c0_4 = arith.constant 0 : index
    %5 = vector.load %arg2[%c0_2, %c0_3, %c0_4] : memref<1x32x32xbf16, #tpu.memory_space<vmem>>, vector<1x32x32xbf16>
    %6 = vector.shape_cast %5 : vector<1x32x32xbf16> to vector<32x32xbf16>
    %cst = arith.constant dense<0.000000e+00> : vector<2x32xf32>
    %7 = tpu.matmul %4, %6, %cst {dimension_numbers = #tpu.dot_dimension_numbers<[1], [0], [0], [1], [0, 0, 1, 1], [], []>} : vector<2x32xbf16>, vector<32x32xbf16>, vector<2x32xf32> -> vector<2x32xf32>
    %cst_5 = arith.constant dense<0.000000e+00> : vector<32xf32>
    %8 = vector.multi_reduction <add>, %7, %cst_5 [0] : vector<2x32xf32> to vector<32xf32>
    %9 = vector.shape_cast %8 : vector<32xf32> to vector<1x32xf32>
    %cst_6 = arith.constant 2.000000e+00 : f32
    %10 = vector.broadcast %cst_6 : f32 to vector<1x32xf32>
    %11 = arith.divf %9, %10 : vector<1x32xf32>
    %12 = arith.mulf %7, %7 : vector<2x32xf32>
    %cst_7 = arith.constant dense<0.000000e+00> : vector<32xf32>
    %13 = vector.multi_reduction <add>, %12, %cst_7 [0] : vector<2x32xf32> to vector<32xf32>
    %14 = vector.shape_cast %13 : vector<32xf32> to vector<1x32xf32>
    %cst_8 = arith.constant 2.000000e+00 : f32
    %15 = vector.broadcast %cst_8 : f32 to vector<1x32xf32>
    %16 = arith.divf %14, %15 : vector<1x32xf32>
    %17 = arith.mulf %11, %11 : vector<1x32xf32>
    %18 = arith.subf %16, %17 : vector<1x32xf32>
    %c0_9 = arith.constant 0 : index
    %c0_10 = arith.constant 0 : index
    %c0_11 = arith.constant 0 : index
    %19 = vector.load %arg3[%c0_9, %c0_10, %c0_11] : memref<1x2x32xf32, #tpu.memory_space<vmem>>, vector<1x2x32xf32>
    %20 = vector.shape_cast %19 : vector<1x2x32xf32> to vector<2x32xf32>
    %21 = vector.extract_strided_slice %20 {offsets = [0, 0], sizes = [1, 32], strides = [1, 1]} : vector<2x32xf32> to vector<1x32xf32>
    %22 = vector.extract_strided_slice %20 {offsets = [1, 0], sizes = [1, 32], strides = [1, 1]} : vector<2x32xf32> to vector<1x32xf32>
    %cst_12 = arith.constant 9.99999974E-6 : f32
    %23 = vector.broadcast %cst_12 : f32 to vector<1x32xf32>
    %24 = arith.addf %18, %23 : vector<1x32xf32>
    %25 = math.rsqrt %24 : vector<1x32xf32>
    %26 = arith.mulf %21, %25 : vector<1x32xf32>
    %27 = arith.mulf %11, %26 : vector<1x32xf32>
    %28 = arith.subf %22, %27 : vector<1x32xf32>
    %29 = vector.broadcast %26 : vector<1x32xf32> to vector<2x32xf32>
    %30 = arith.mulf %7, %29 : vector<2x32xf32>
    %31 = vector.broadcast %28 : vector<1x32xf32> to vector<2x32xf32>
    %32 = arith.addf %30, %31 : vector<2x32xf32>
    %c2_i32 = arith.constant 2 : i32
    %33 = arith.cmpi slt, %arg0, %c2_i32 : i32
    %34 = arith.extui %33 : i1 to i32
    %c0_i32_13 = arith.constant 0 : i32
    %35 = arith.cmpi ne, %34, %c0_i32_13 : i32
    scf.if %35 {
      %cst_16 = arith.constant 0.000000e+00 : f32
      %39 = vector.broadcast %cst_16 : f32 to vector<2x32xf32>
      %40 = arith.cmpf ogt, %32, %39 : vector<2x32xf32>
      %cst_17 = arith.constant 2.000000e-01 : f32
      %41 = vector.broadcast %cst_17 : f32 to vector<2x32xf32>
      %42 = arith.mulf %41, %32 : vector<2x32xf32>
      %43 = arith.select %40, %32, %42 : vector<2x32xi1>, vector<2x32xf32>
      %c0_18 = arith.constant 0 : index
      %c0_19 = arith.constant 0 : index
      %44 = vector.load %arg5[%c0_18, %c0_19] : memref<2x32xf32, #tpu.memory_space<vmem>>, vector<2x32xf32>
      tpu.vector_store %arg5[%c0_18, %c0_19], %43 {strides = array<i32>} : memref<2x32xf32, #tpu.memory_space<vmem>>, vector<2x32xf32>,
    } else {
    }
    %c2_i32_14 = arith.constant 2 : i32
    %36 = arith.cmpi eq, %arg0, %c2_i32_14 : i32
    %37 = arith.extui %36 : i1 to i32
    %c0_i32_15 = arith.constant 0 : i32
    %38 = arith.cmpi ne, %37, %c0_i32_15 : i32
    scf.if %38 {
      %39 = math.tanh %32 : vector<2x32xf32>
      %c0_16 = arith.constant 0 : index
      %c0_17 = arith.constant 0 : index
      %40 = vector.load %arg4[%c0_16, %c0_17] : memref<2x32xf32, #tpu.memory_space<vmem>>, vector<2x32xf32>
      tpu.vector_store %arg4[%c0_16, %c0_17], %39 {strides = array<i32>} : memref<2x32xf32, #tpu.memory_space<vmem>>, vector<2x32xf32>,
    } else {
    }
    return
  }
  func.func @transform_0(%arg0: i32) -> (i32, i32) {
    %c0_i32 = arith.constant 0 : i32
    %c0_i32_0 = arith.constant 0 : i32
    %c0_i32_1 = arith.constant 0 : i32
    return %c0_i32, %c0_i32_0 : i32, i32
  }
  func.func @transform_1(%arg0: i32) -> (i32, i32, i32) {
    %c0_i32 = arith.constant 0 : i32
    %c0_i32_0 = arith.constant 0 : i32
    %c0_i32_1 = arith.constant 0 : i32
    return %arg0, %c0_i32, %c0_i32_0 : i32, i32, i32
  }
  func.func @transform_2(%arg0: i32) -> (i32, i32, i32) {
    %c0_i32 = arith.constant 0 : i32
    %c0_i32_0 = arith.constant 0 : i32
    %c0_i32_1 = arith.constant 0 : i32
    return %arg0, %c0_i32, %c0_i32_0 : i32, i32, i32
  }
  func.func @transform_3(%arg0: i32) -> (i32, i32) {
    %c0_i32 = arith.constant 0 : i32
    %c0_i32_0 = arith.constant 0 : i32
    %c0_i32_1 = arith.constant 0 : i32
    return %c0_i32, %c0_i32_0 : i32, i32
  }
}

</mosaic_0001>

<bundles_post_ra>
// kernel: samplenet_forward.1
= control target key start
LH: loop header
LB: loop body
LE: loop exit
PB: predicated region body
PF: predicated region fallthrough
CT: control target
= control target key end

     0   :  { %8 = vsyncpa [#allocation4], 0  ;;  %s841_s0 = inlined_call_operand.hbm [shape: f32[2,32], index: 0, kind: input, shape index: {}]   ;;  %s842_s1 = inlined_call_operand.hbm [shape: bf16[3,32,32], index: 1, kind: input, shape index: {}]   ;;  %s843_s2 = inlined_call_operand.hbm [shape: f32[3,2,32], index: 2, kind: input, shape index: {}]   ;;  %s844_s3 = inlined_call_operand.vmem [shape: f32[2,32], index: 3, kind: output, shape index: {}]  }
   0x1   :  { %9 = vsyncpa [#allocation6], 0 }
   0x2   :  { %11 = vsyncpa [#allocation6 + $0x1], 0  ;;  %s665_s12 = smov 0   ;;  %s667_s13 = smov 0  }
   0x3   :  { %s669_s14 = smov 0   ;;  %s671_s15 = smov 0  }
   0x4 LB: > { %s686_s16 = sadd.s32 1, %s636_s15   ;;  %s45_s17 = sadd.s32 1, %s632_s14  ;;  %s636_s15 = sphi %s671_s15, %s859_s15   ;;  %s632_s14 = sphi %s669_s14, %s858_s14   ;;  %s628_s13 = sphi %s667_s13, %s857_s13   ;;  %s624_s12 = sphi %s665_s12, %s856_s12  }
   0x5   : > { %s42_s18 = ssub.s32 %s636_s15, %s686_s16  ;;  %p52_p0 = scmp.ne.s32.totalorder %s632_s14, %s628_s13 }
   0x6   : > { %p43_p1 = scmp.eq.s32.totalorder %s42_s18, 0  ;;  %p53_p2 = scmp.eq.s32.totalorder %s636_s15, 0 }
   0x7   : > { %p471_p3 = scmp.lt.s32.totalorder %s636_s15, 3  ;;  %s140_s20 = sand.u32 1, %s636_s15  }
   0x8   : > { %s696_s19 = scalar_select %p43_p1, %s632_s14, %s45_s17  }
   0x9   : > { %p54_p4 = por %p53_p2, %p52_p0  ;;  %s142_s21 = sand.u32 1, %s632_s14  }
   0xa   : > { %s422_s22 = sshll.u32 %s142_s21, 4  ;;  %s439_s23 = sshll.u32 %s636_s15, 8 }
   0xb   : > { %s706_s26 = scalar_lea.hbm %s842_s1, %s439_s23  ;;  %s144_s27 = scalar_lea.vmem [#allocation5], %s422_s22 }
   0xc   : > { %s151_s28 = sshll.u32 %s144_s27, 4  ;;  %p708_p5 = pnand %p471_p3, %p54_p4  ;;  %s712_s28 = int_to_ptr.vmem [resolvable:$true] %s151_s28 }
   0xd   : > { %s714_s30 = scalar_lea.sflag [#allocation6], %s140_s20  ;;  %s516_s4 = scalar_lea.hbm %s706_s26, 256 }
   0xe   : > { %p517_p6 = scmp.ne.s32.totalorder %s706_s26, %s516_s4  ;;  %p845_p7 = pneg %p708_p5 }
   0xf   : > { %s521_s7 = scalar_lea.hbm %s842_s1, 768  ;;  %p522_p10 = scmp.lt.s32.totalorder %s706_s26, %s842_s1 }
  0x10   : > { %p519_p8 = pnand %p845_p7, %p517_p6  ;;  %p523_p11 = scmp.lt.s32.totalorder %s521_s7, %s516_s4 }
  0x12   : > { %p520_p9 = pneg %p519_p8  ;;  %p524_p12 = por %p523_p11, %p522_p10 }
  0x14   : > { %p525_p13 = pnand %p524_p12, %p520_p9 }
  0x16   : > { %528 = shalt.err (!%p525_p13)
}
  0x17   : > { %s529_s10 = scalar_lea.vmem %s712_s28, 256  ;;  %s638_s11 = smov [#allocation5]  }
  0x18   : > { %p530_p0 = scmp.ne.s32.totalorder %s712_s28, %s529_s10  ;;  %s534_s17 = sshll.u32 %s638_s11, 4  ;;  %s535_s17 = int_to_ptr.vmem [resolvable:$false] %s534_s17 }
  0x19   : > { %s536_s18 = scalar_lea.vmem %s535_s17, 512  ;;  %p537_p3 = scmp.lt.s32.totalorder %s712_s28, %s535_s17 }
  0x1a   : > { %p532_p1 = pnand %p530_p0, %p845_p7  ;;  %p538_p4 = scmp.lt.s32.totalorder %s536_s18, %s529_s10 }
  0x1c   : > { %p533_p2 = pneg %p532_p1  ;;  %p539_p6 = por %p538_p4, %p537_p3 }
  0x1e   : > { %p540_p8 = pnand %p539_p6, %p533_p2 }
  0x20   : > { %543 = shalt.err (!%p540_p8)
}
  0x21   : > { %s639_s20 = smov 64   ;;  %s640_s22 = smov 4  }
  0x22   : > { %466 = dma.hbm_to_vmem [thread:$0]  (!%p708_p5), %s706_s26, 256, %s712_s28, %s714_s30, %s639_s20, %s639_s20, %s640_s22  }
  0x23   : > { %s742_s23 = sadd.s32 4294967295, %s636_s15   ;;  %p58_p10 = scmp.ne.s32.totalorder %s628_s13, %s624_s12 }
  0x24   : > { %p846_p9 = scmp.eq.s32.totalorder %s742_s23, 0  ;;  %p419_p11 = scmp.ge.s32.totalorder %s636_s15, 1 }
  0x25   : > { %p116_p12 = scmp.lt.s32.totalorder %s636_s15, 4  ;;  %s641_s26 = smov [#allocation3]  }
  0x26   : > { %p752_p0 = por %p846_p9, %p58_p10  ;;  %s129_s27 = sshll.u32 %s641_s26, 4  ;;  %s130_s27 = int_to_ptr.vmem [resolvable:$true] %s129_s27 }
  0x27   : > { %p756_p1 = pnand %p419_p11, %p116_p12  ;;  %s425_s28 = sshll.u32 %s142_s21, 1 }
  0x28   : > { %s849_s24 = scalar_select %p752_p0, 1, 0 }
  0x29   : > { %p459_p2 = pneg %p756_p1  ;;  %s426_s12 = sshll.u32 %s636_s15, 5 }
  0x2a   : > { %s165_s4 = scalar_lea.vmem [#allocation7], %s425_s28  ;;  %s770_s8 = scalar_lea.hbm %s843_s2, %s426_s12 }
  0x2b   : > { %s172_s5 = sshll.u32 %s165_s4, 4  ;;  %p460_p3 = pnand %p459_p2, %p846_p9  ;;  %s772_s5 = int_to_ptr.vmem [resolvable:$true] %s172_s5 }
  0x2c   : > { %s555_s9 = scalar_lea.vmem %s130_s27, 32  ;;  %p563_p11 = scmp.lt.s32.totalorder %s130_s27, %s130_s27 }
  0x2d   : > { %p546_p4 = pneg %p460_p3  ;;  %p556_p6 = scmp.ne.s32.totalorder %s130_s27, %s555_s9 }
  0x2e   : > { %p564_p12 = scmp.lt.s32.totalorder %s555_s9, %s555_s9 }
  0x2f   : > { %p558_p8 = pnand %p556_p6, %p546_p4 }
  0x30   : > { %p565_p13 = por %p564_p12, %p563_p11 }
  0x31   : > { %p559_p10 = pneg %p558_p8 }
  0x33   : > { %p566_p7 = pnand %p565_p13, %p559_p10 }
  0x35   : > { %569 = shalt.err (!%p566_p7)
}
  0x36   : > { %462 = dma.hbm_to_vmem [thread:$0]  (!%p460_p3), %s841_s0, 32, %s130_s27, [#allocation4]  }
  0x37   : > { %s570_s10 = scalar_lea.hbm %s770_s8, 32  ;;  %p851_p9 = pneg %p708_p5 }
  0x38   : > { %p571_p2 = scmp.ne.s32.totalorder %s770_s8, %s570_s10  ;;  %s575_s18 = scalar_lea.hbm %s843_s2, 96 }
  0x39   : > { %p576_p7 = scmp.lt.s32.totalorder %s770_s8, %s843_s2  ;;  %p577_p13 = scmp.lt.s32.totalorder %s575_s18, %s570_s10 }
  0x3a   : > { %p573_p0 = pnand %p571_p2, %p851_p9 }
  0x3b   : > { %p578_p6 = por %p577_p13, %p576_p7 }
  0x3c   : > { %p574_p4 = pneg %p573_p0 }
  0x3e   : > { %p579_p8 = pnand %p578_p6, %p574_p4 }
  0x40   : > { %582 = shalt.err (!%p579_p8)
}
  0x41   : > { %s583_s26 = scalar_lea.vmem %s772_s5, 32  ;;  %s642_s27 = smov [#allocation7]  }
  0x42   : > { %p584_p3 = scmp.ne.s32.totalorder %s772_s5, %s583_s26  ;;  %s588_s28 = sshll.u32 %s642_s27, 4  ;;  %s589_s28 = int_to_ptr.vmem [resolvable:$false] %s588_s28 }
  0x43   : > { %s590_s12 = scalar_lea.vmem %s589_s28, 64  ;;  %p591_p11 = scmp.lt.s32.totalorder %s772_s5, %s589_s28 }
  0x44   : > { %p586_p0 = pnand %p584_p3, %p851_p9  ;;  %p592_p12 = scmp.lt.s32.totalorder %s590_s12, %s583_s26 }
  0x46   : > { %p587_p10 = pneg %p586_p0  ;;  %p593_p2 = por %p592_p12, %p591_p11 }
  0x48   : > { %p594_p7 = pnand %p593_p2, %p587_p10 }
  0x4a   : > { %597 = shalt.err (!%p594_p7)
}
  0x4b   : > { %469 = dma.hbm_to_vmem [thread:$0]  (!%p708_p5), %s770_s8, 32, %s772_s5, %s714_s30  }
  0x4c   : > { %181 = sbr.rel (%p756_p1) target bundleno = 371 (0x173), region = 32  ;;  %p852_p4 = scmp.eq.s32.totalorder (!%p756_p1), %s742_s23, 0 }
  0x51   : > { %615 = dma.done.wait (%p852_p4), [#allocation4], 32   ;;  %p853_p13 = pmov %p852_p4 }
  0x52   : > { %s187_s4 = sand.u32 1, %s742_s23   ;;  %s189_s6 = sand.u32 1, %s628_s13  }
  0x53   : > { %617 = vsyncadd (%p853_p13), [#allocation4], 4294967264  ;;  %s429_s7 = sshll.u32 %s189_s6, 4  ;;  %s188_s29 = scalar_lea.sflag [#allocation6], %s187_s4 }
  0x54   : > { %s191_s9 = scalar_lea.vmem [#allocation5], %s429_s7  ;;  %p854_p6 = scmp.ne.s32.totalorder %s849_s24, 0 }
  0x56   : > { %619 = dma.done.wait (%p854_p6), %s188_s29, 288  }
  0x57   : > { %621 = vsyncadd (%p854_p6), %s188_s29, 4294967008  ;;  %s812_s30 = sshll.u32 %s189_s6, 1  ;;  %p855_p5 = scmp.ne.s32.totalorder %s742_s23, 0 }
  0x58   : > { %s200_s25 = scalar_lea.vmem [#allocation7], %s812_s30 }
  0x59   : > { %227 = sbr.rel (%p855_p5) target bundleno = 96 (0x60), region = 48 }
  0x5e   : > { %v228_v0 = vld [vmem:[#allocation3] sm:$0x3]  ;;  %vm229_vm0 = vcmask 254976  }
  0x5f   : > { %230 = vst.msk [vmem:[#allocation2] sm:$0x3] %vm229_vm0, %v228_v0 }
  0x60 PF: > { %v510_v1 = vld [vmem:[%s191_s9 + $0x8] sm:$0xff]   ;;  %v643_v2 = vmov 0.0   ;;  %v511_v3 = vld [vmem:[%s191_s9] sm:$0xff]   ;;  %vm644_vm1 = vmmov 0   ;;  %vm249_vm2 = vcmask 261120   ;;  %vm293_vm3 = vcmask 254976  }
  0x61   : > { %443 = vmatprep.subr.bf16.mxu0 %v643_v2  ;;  %447 = vmatprep.mubr.msk.bf16.mxu0 %vm644_vm1, %v643_v2  ;;  %v323_v30 = vlaneseq  ;;  %v314_v32 = vld [vmem:[%s200_s25] sm:$0x3]  ;;  %p435_p1 = scmp.ge.s32.totalorder %s742_s23, 2 }
  0x62   : > { %444 = vmatpush3.bf16.msra.mxu0 %v510_v1 }
  0x63   : > { %445 = vmatprep.subr.bf16.mxu0 %v643_v2  ;;  %v324_v31 = vshrl.u32 %v323_v30, 7 }
  0x65   : > { %v325_v35 = vsub.s32 0, %v324_v31  ;;  %v330_v39 = vsub.s32 1, %v324_v31 }
  0x66   : > { %v231_v4 = vld [vmem:[#allocation2] sm:$0x3]  ;;  %446 = vmatpush3.bf16.msra.mxu0 %v511_v3 }
  0x67   : > { %v232_v5 = vpack.c.bf16 %v231_v4, %v231_v4 }
  0x69   : > { %448 = vmatmul.mubr.msk.bf16.vlgmr.msra.gmra.mxu0 %vm249_vm2, %v232_v5 }
 0x129   : > { %v287_v6 = vpop.f32.mrf.mxu0 }
 0x12a   : > { %v294_v7 = vsel %vm293_vm3, %v287_v6, 0.0  ;;  %v303_v8 = vmul.f32 %v287_v6, %v287_v6 }
 0x12b   : > { %v295_v9 = vrot.slane %v294_v7, 4  ;;  %v449_v10 = vpop.f32.mrf.mxu0 }
 0x12c   : > { %v304_v11 = vsel %vm293_vm3, %v303_v8, 0.0 }
 0x12d   : > { %v296_v12 = vadd.f32 %v295_v9, %v294_v7  ;;  %v305_v13 = vrot.slane %v304_v11, 4  ;;  %v290_v14 = vpop.f32.mrf.mxu0 }
 0x12f   : > { %v297_v15 = vrot.slane %v296_v12, 2  ;;  %v306_v16 = vadd.f32 %v305_v13, %v304_v11  ;;  %v450_v17 = vpop.f32.mrf.mxu0 }
 0x131   : > { %v298_v18 = vadd.f32 %v297_v15, %v296_v12  ;;  %v307_v19 = vrot.slane %v306_v16, 2 }
 0x133   : > { %v299_v20 = vrot.slane %v298_v18, 1  ;;  %v308_v21 = vadd.f32 %v307_v19, %v306_v16 }
 0x135   : > { %v300_v22 = vadd.f32 %v299_v20, %v298_v18  ;;  %v309_v23 = vrot.slane %v308_v21, 1 }
 0x137   : > { %v302_v24 = vmul.f32 0.5, %v300_v22  ;;  %v310_v25 = vadd.f32 %v309_v23, %v308_v21 }
 0x139   : > { %v311_v26 = vmul.f32 0.5, %v310_v25  ;;  %v312_v27 = vmul.f32 %v302_v24, %v302_v24 }
 0x13b   : > { %v313_v28 = vsub.f32 %v311_v26, %v312_v27 }
 0x13d   : > { %v315_v29 = vadd.f32 1e-05, %v313_v28 }
 0x13f   : > { %512 = vrsqrt.f32 %v315_v29 }
 0x14c   : > { %v513_v33 = vpop.eup %512 }
 0x14d   : > { %v317_v34 = vmul.f32 %v513_v33, %v314_v32 }
 0x14f   : > { %v318_v36 = vmul.f32 %v317_v34, %v302_v24  ;;  %v326_v38 = vrot.slane %v317_v34, %v325_v35 }
 0x151   : > { %v320_v37 = vrot.slane %v318_v36, 7  ;;  %v327_v41 = vmul.f32 %v326_v38, %v287_v6 }
 0x153   : > { %v322_v40 = vsub.f32 %v314_v32, %v320_v37  ;;  %336 = sbr.rel (%p435_p1) target bundleno = 349 (0x15d), region = 52 }
 0x155   : > { %v331_v42 = vrot.slane %v322_v40, %v330_v39 }
 0x157   : > { %v332_v43 = vadd.f32 %v331_v42, %v327_v41 }
 0x159   : > { %vm337_vm4 = vcmp.gt.f32.partialorder %v332_v43, 0.0  ;;  %v338_v44 = vmul.f32 0.2, %v332_v43 }
 0x15b   : > { %v339_v45 = vsel %vm337_vm4, %v332_v43, %v338_v44 }
 0x15c   : > { %340 = vst.msk [vmem:[#allocation2] sm:$0x3] %vm293_vm3, %v339_v45 }
 0x15d PF: > { %p436_p8 = scmp.ne.s32.totalorder %s742_s23, 2 }
 0x15f   : > { %344 = sbr.rel (%p436_p8) target bundleno = 371 (0x173), region = 56 }
 0x164   : > { %514 = vtanh.f32 %v332_v43 }
 0x171   : > { %v515_v46 = vpop.eup %514 }
 0x172   : > { %346 = vst.msk [vmem:[%s844_s3] sm:$0x3] %vm293_vm3, %v515_v46 }
 0x173 PF: > { %p14_p3 = scmp.ge.s32.totalorder %s686_s16, 5   ;;  %s856_s12 = smov %s628_s13 }
 0x174   : > { %s857_s13 = smov %s632_s14  ;;  %s858_s14 = smov %s696_s19 }
 0x175   : > { %s859_s15 = smov %s686_s16  ;;  %16 = sbr.rel (!%p14_p3) target bundleno = 4 (0x4), region = 96 }
 0x17a   :  { %358 = vsyncpa [#allocation4], 1 }
 0x17b   :  { %360 = vsyncpa [#allocation4 + $0x1], 1 }
 0x17c   :  { %361 = vsyncpa [#allocation6], 1 }
 0x17d   :  { %363 = vsyncpa [#allocation6 + $0x1], 1 }

</bundles_post_ra>
